<compile_context>
chip_gen: v6e
topology: v6e:2x2x1
jax: 0.10.0
libtpu: 0.0.40
codegen_flags: <defaults>
</compile_context>

<pallas_src>
import functools

import numpy as np
import jax
import jax.numpy as jnp
from jax import lax
from jax.experimental import pallas as pl
from jax.experimental.pallas import tpu as pltpu


def _vmem_limit_bytes():
    # v5e/v6e: 128 MiB physical VMEM -> allow 64 MiB blocks (review: the old
    # 32 MiB cap was needlessly small there).  v7x: 64 MiB physical -> 32 MiB.
    try:
        cap = pltpu.get_tpu_info().vmem_capacity_bytes
    except Exception:
        cap = 96 * 1024 * 1024
    return max(32 * 1024 * 1024, min(96 * 1024 * 1024, cap // 2))


_COMPILER_PARAMS = pltpu.CompilerParams(
    dimension_semantics=("parallel",),
    vmem_limit_bytes=_vmem_limit_bytes(),
)


# ---------------------------------------------------------------------------
# Shared helpers (traced inside kernels).
# ---------------------------------------------------------------------------
def _zero_border(pad_ref, Ho, Wo, C):
    # Zero only the 1-pixel halo; the interior is fully overwritten each grid
    # step.  Done every step (cheap: O((Ho+Wo)*C)) instead of once under
    # pl.when(program_id==0) so each core's private scratch is initialised
    # even when the batch grid is sharded across TensorCores.
    zrow = jnp.zeros((1, Wo + 2, C), pad_ref.dtype)
    zcol = jnp.zeros((Ho + 2, 1, C), pad_ref.dtype)
    pad_ref[0:1, :, :] = zrow
    pad_ref[Ho + 1:Ho + 2, :, :] = zrow
    pad_ref[:, 0:1, :] = zcol
    pad_ref[:, Wo + 1:Wo + 2, :] = zcol


def _conv3x3_acc(pad_ref, w_ref, Ho, Wo, Cin):
    # 3x3 conv as 9 accumulating MXU matmuls on shifted padded slices.
    # (MXU is idle at these channel widths, so the extra matmul pushes are
    # free; this removes the big 9-slab concatenate copy of the old version.)
    acc = None
    tap = 0
    for dh in range(3):
        for dw in range(3):
            slab = pad_ref[dh:dh + Ho, dw:dw + Wo, :].reshape(Ho * Wo, Cin)
            part = jnp.dot(slab, w_ref[tap], preferred_element_type=jnp.float32)
            acc = part if acc is None else acc + part
            tap += 1
    return acc  # (Ho*Wo, Cout) f32


# ---------------------------------------------------------------------------
# Kernel U: ConvTranspose2d(k=2, s=2).  kernel==stride => one matmul
#   (H*W, Cin) @ (Cin, 4*Cout) + bias, columns ordered (a, b, co).
#   Output stored in bf16 (bit-identical downstream: conv1 consumes bf16).
# ---------------------------------------------------------------------------
def _upconv_kernel(x_ref, w_ref, b_ref, o_ref):
    o_ref[0] = (
        jnp.dot(x_ref[0], w_ref[...], preferred_element_type=jnp.float32)
        + b_ref[...]
    ).astype(o_ref.dtype)


# ---------------------------------------------------------------------------
# Kernel A: fused [concat(up, cropped skip)] -> Conv3x3 (pre-BN, bf16 out)
#           + per-image BN partial stats (f32 sum, sumsq).
# ---------------------------------------------------------------------------
def _conv1_stats_kernel(up_ref, cx_ref, w_ref, y_ref, st_ref, pad_ref):
    _, Ho, Wo, Cou = up_ref.shape
    Cc = cx_ref.shape[3]
    Ccat = Cou + Cc

    _zero_border(pad_ref, Ho, Wo, Ccat)
    # crop + channel-concat fused: both inputs land in one padded VMEM image.
    pad_ref[1:Ho + 1, 1:Wo + 1, 0:Cou] = up_ref[0]
    pad_ref[1:Ho + 1, 1:Wo + 1, Cou:Ccat] = cx_ref[0]

    acc = _conv3x3_acc(pad_ref, w_ref, Ho, Wo, Ccat)        # (Ho*Wo, Cmid) f32

    y_ref[0] = acc.reshape(Ho, Wo, -1).astype(y_ref.dtype)  # bf16 store
    st_ref[0, 0:1, :] = jnp.sum(acc, axis=0, keepdims=True)
    st_ref[0, 1:2, :] = jnp.sum(acc * acc, axis=0, keepdims=True)


# ---------------------------------------------------------------------------
# Kernel B: finalize BN1 (reduce per-image partials) + ReLU, then Conv3x3 #2
#           (pre-BN, bf16 out) + per-image BN2 partial stats.
# ---------------------------------------------------------------------------
def _bn_relu_conv2_kernel(y1_ref, st1_ref, w_ref, y2_ref, st2_ref, pad_ref, *,
                          n_images):
    _, Ho, Wo, Cmid = y1_ref.shape
    cnt = jnp.float32(n_images * Ho * Wo)   # explicit batch size, not inferred

    st = st1_ref[...]                                           # (N, 2, Cmid)
    mean = jnp.sum(st[:, 0:1, :], axis=0, keepdims=True) / cnt  # (1, 1, Cmid)
    msq = jnp.sum(st[:, 1:2, :], axis=0, keepdims=True) / cnt
    inv = lax.rsqrt(msq - mean * mean + 1e-5)                   # gamma=1, beta=0

    act = jnp.maximum((y1_ref[0].astype(jnp.float32) - mean) * inv, 0.0)

    _zero_border(pad_ref, Ho, Wo, Cmid)
    pad_ref[1:Ho + 1, 1:Wo + 1, :] = act.astype(pad_ref.dtype)

    acc = _conv3x3_acc(pad_ref, w_ref, Ho, Wo, Cmid)

    y2_ref[0] = acc.reshape(Ho, Wo, -1).astype(y2_ref.dtype)   # bf16 store
    st2_ref[0, 0:1, :] = jnp.sum(acc, axis=0, keepdims=True)
    st2_ref[0, 1:2, :] = jnp.sum(acc * acc, axis=0, keepdims=True)


# ---------------------------------------------------------------------------
# Kernel C: finalize BN2 + ReLU (elementwise).
# ---------------------------------------------------------------------------
def _bn_relu_kernel(y_ref, st_ref, o_ref, *, n_images):
    _, Ho, Wo, _ = y_ref.shape
    cnt = jnp.float32(n_images * Ho * Wo)
    st = st_ref[...]
    mean = jnp.sum(st[:, 0:1, :], axis=0, keepdims=True) / cnt
    msq = jnp.sum(st[:, 1:2, :], axis=0, keepdims=True) / cnt
    inv = lax.rsqrt(msq - mean * mean + 1e-5)
    o_ref[0] = jnp.maximum((y_ref[0].astype(jnp.float32) - mean) * inv, 0.0)


# ---------------------------------------------------------------------------
# UpAndConcat.forward
# ---------------------------------------------------------------------------
def up_and_concat_forward(x_nchw, contracting_nchw, params):
    f32, bf16 = jnp.float32, jnp.bfloat16
    N, Ciu, H, W = x_nchw.shape
    Cou = params["w_up"].shape[1]
    Cc = contracting_nchw.shape[1]
    Cmid = params["w_conv1"].shape[0]
    Cout = params["w_conv2"].shape[0]
    Ho, Wo = 2 * H, 2 * W
    Ccat = Cou + Cc

    # ---- cheap XLA layout glue: NCHW->NHWC, crop, weight packing, bf16 ----
    x2d = jnp.transpose(x_nchw, (0, 2, 3, 1)).reshape(N, H * W, Ciu).astype(bf16)
    cx = jnp.transpose(contracting_nchw, (0, 2, 3, 1))
    Hc, Wc = cx.shape[1], cx.shape[2]
    assert Hc >= Ho and Wc >= Wo  # TODO(synk): center_crop padding branch
    # torchvision center_crop uses int(round((in-out)/2.0)) -- matched exactly.
    top = int(round((Hc - Ho) / 2.0))
    left = int(round((Wc - Wo) / 2.0))
    cxc = cx[:, top:top + Ho, left:left + Wo, :].astype(bf16)

    w_up = jnp.transpose(params["w_up"], (0, 2, 3, 1)).reshape(Ciu, 4 * Cou).astype(bf16)
    b_up = jnp.tile(params["b_up"], 4).reshape(1, 4 * Cou).astype(f32)
    # conv weights packed tap-major: (9, Cin, Cout) -> one small matmul per tap.
    w1 = jnp.transpose(params["w_conv1"], (2, 3, 1, 0)).reshape(9, Ccat, Cmid).astype(bf16)
    w2 = jnp.transpose(params["w_conv2"], (2, 3, 1, 0)).reshape(9, Cmid, Cout).astype(bf16)

    # ---- Kernel U: transposed conv as one matmul per image (bf16 out) ------
    up_flat = pl.pallas_call(
        _upconv_kernel,
        out_shape=jax.ShapeDtypeStruct((N, H * W, 4 * Cou), bf16),
        grid=(N,),
        in_specs=[pl.BlockSpec((1, H * W, Ciu), lambda n: (n, 0, 0)),
                  pl.BlockSpec((Ciu, 4 * Cou), lambda n: (0, 0)),
                  pl.BlockSpec((1, 4 * Cou), lambda n: (0, 0))],
        out_specs=pl.BlockSpec((1, H * W, 4 * Cou), lambda n: (n, 0, 0)),
        compiler_params=_COMPILER_PARAMS,
        cost_estimate=pl.CostEstimate(
            flops=2 * N * H * W * Ciu * 4 * Cou,
            transcendentals=0,
            bytes_accessed=(N * H * W * Ciu * 2 + Ciu * 4 * Cou * 2
                            + 4 * Cou * 4 + N * H * W * 4 * Cou * 2)),
    )(x2d, w_up, b_up)

    # small XLA glue (bf16): scatter the 2x2 deconv taps onto the upsampled
    # grid.  TODO(synk): fold this interleave + the deconv matmul into the
    # conv1 kernel (needs strided VMEM stores / relayout support).
    up_img = (up_flat.reshape(N, H, W, 2, 2, Cou)
              .transpose(0, 1, 3, 2, 4, 5)
              .reshape(N, Ho, Wo, Cou))

    # ---- Kernel A: concat + conv1 (pre-BN, bf16) + BN1 partial stats -------
    y1, stats1 = pl.pallas_call(
        _conv1_stats_kernel,
        out_shape=(jax.ShapeDtypeStruct((N, Ho, Wo, Cmid), bf16),
                   jax.ShapeDtypeStruct((N, 2, Cmid), f32)),
        grid=(N,),
        in_specs=[pl.BlockSpec((1, Ho, Wo, Cou), lambda n: (n, 0, 0, 0)),
                  pl.BlockSpec((1, Ho, Wo, Cc), lambda n: (n, 0, 0, 0)),
                  # constant index map: weights stay VMEM-resident across batch
                  pl.BlockSpec((9, Ccat, Cmid), lambda n: (0, 0, 0))],
        out_specs=(pl.BlockSpec((1, Ho, Wo, Cmid), lambda n: (n, 0, 0, 0)),
                   pl.BlockSpec((1, 2, Cmid), lambda n: (n, 0, 0))),
        scratch_shapes=[pltpu.VMEM((Ho + 2, Wo + 2, Ccat), jnp.bfloat16)],
        compiler_params=_COMPILER_PARAMS,
        cost_estimate=pl.CostEstimate(
            flops=2 * N * Ho * Wo * 9 * Ccat * Cmid,
            transcendentals=0,
            bytes_accessed=(N * Ho * Wo * Ccat * 2 + 9 * Ccat * Cmid * 2
                            + N * Ho * Wo * Cmid * 2 + N * 2 * Cmid * 4)),
    )(up_img, cxc, w1)

    # ---- Kernel B: BN1+ReLU finalize, conv2 (pre-BN, bf16) + BN2 stats -----
    y2, stats2 = pl.pallas_call(
        functools.partial(_bn_relu_conv2_kernel, n_images=N),
        out_shape=(jax.ShapeDtypeStruct((N, Ho, Wo, Cout), bf16),
                   jax.ShapeDtypeStruct((N, 2, Cout), f32)),
        grid=(N,),
        in_specs=[pl.BlockSpec((1, Ho, Wo, Cmid), lambda n: (n, 0, 0, 0)),
                  pl.BlockSpec((N, 2, Cmid), lambda n: (0, 0, 0)),
                  pl.BlockSpec((9, Cmid, Cout), lambda n: (0, 0, 0))],
        out_specs=(pl.BlockSpec((1, Ho, Wo, Cout), lambda n: (n, 0, 0, 0)),
                   pl.BlockSpec((1, 2, Cout), lambda n: (n, 0, 0))),
        scratch_shapes=[pltpu.VMEM((Ho + 2, Wo + 2, Cmid), jnp.bfloat16)],
        compiler_params=_COMPILER_PARAMS,
        cost_estimate=pl.CostEstimate(
            flops=2 * N * Ho * Wo * 9 * Cmid * Cout + 6 * N * Ho * Wo * Cmid,
            transcendentals=N * Cmid,
            bytes_accessed=(N * Ho * Wo * Cmid * 2 + N * 2 * Cmid * 4
                            + 9 * Cmid * Cout * 2
                            + N * Ho * Wo * Cout * 2 + N * 2 * Cout * 4)),
    )(y1, stats1, w2)

    # ---- Kernel C: BN2 + ReLU finalize -------------------------------------
    out_nhwc = pl.pallas_call(
        functools.partial(_bn_relu_kernel, n_images=N),
        out_shape=jax.ShapeDtypeStruct((N, Ho, Wo, Cout), f32),
        grid=(N,),
        in_specs=[pl.BlockSpec((1, Ho, Wo, Cout), lambda n: (n, 0, 0, 0)),
                  pl.BlockSpec((N, 2, Cout), lambda n: (0, 0, 0))],
        out_specs=pl.BlockSpec((1, Ho, Wo, Cout), lambda n: (n, 0, 0, 0)),
        compiler_params=_COMPILER_PARAMS,
        cost_estimate=pl.CostEstimate(
            flops=5 * N * Ho * Wo * Cout,
            transcendentals=N * Cout,
            bytes_accessed=(N * Ho * Wo * Cout * 2 + N * 2 * Cout * 4
                            + N * Ho * Wo * Cout * 4)),
    )(y2, stats2)

    return jnp.transpose(out_nhwc, (0, 3, 1, 2))  # back to NCHW


# ---------------------------------------------------------------------------
# Pure-JAX reference (mirrors the kernel's precision policy: bf16 matmul
# operands, f32 accumulation, bf16 storage of the pre-BN conv outputs, f32
# batch statistics).
# ---------------------------------------------------------------------------
def _ref_forward(x, cx, params):
    f32, bf16 = jnp.float32, jnp.bfloat16
    w_up, b_up = params["w_up"], params["b_up"]
    t = jnp.einsum("nihw,ioab->nohawb", x.astype(bf16), w_up.astype(bf16),
                   preferred_element_type=f32)
    N, Co, H, _, W, _ = t.shape
    up = t.reshape(N, Co, 2 * H, 2 * W) + b_up[None, :, None, None]
    Ho, Wo = up.shape[2], up.shape[3]
    Hc, Wc = cx.shape[2], cx.shape[3]
    top = int(round((Hc - Ho) / 2.0))
    left = int(round((Wc - Wo) / 2.0))
    cat = jnp.concatenate([up, cx[:, :, top:top + Ho, left:left + Wo]], axis=1)

    def cbr(h, w):
        y = lax.conv_general_dilated(h.astype(bf16), w.astype(bf16), (1, 1),
                                     ((1, 1), (1, 1)),
                                     dimension_numbers=("NCHW", "OIHW", "NCHW"),
                                     preferred_element_type=f32)
        mean = y.mean(axis=(0, 2, 3), keepdims=True)
        var = ((y - mean) ** 2).mean(axis=(0, 2, 3), keepdims=True)
        yq = y.astype(bf16).astype(f32)   # kernels store the pre-BN output bf16
        return jnp.maximum((yq - mean) * lax.rsqrt(var + 1e-5), 0.0)

    h = cbr(cat, params["w_conv1"])
    h = cbr(h, params["w_conv2"])
    return h


if __name__ == "__main__":
    key = jax.random.PRNGKey(0)
    k1, k2, k3, k4, k5, k6 = jax.random.split(key, 6)

    N = 2
    in_channels, out_channels = 16, 8
    c_contract = 8
    H = W = 8            # x spatial; upsampled to 16x16
    Hc = Wc = 18         # contracting spatial; center-cropped to 16x16
    cat_channels = out_channels + c_contract

    x = jax.random.normal(k1, (N, in_channels, H, W), jnp.float32)
    contracting_x = jax.random.normal(k2, (N, c_contract, Hc, Wc), jnp.float32)

    params = {
        # ConvTranspose2d(in, out, 2, 2): weight (in, out, 2, 2), bias (out,)
        "w_up": jax.random.normal(k3, (in_channels, out_channels, 2, 2), jnp.float32) * 0.1,
        "b_up": jax.random.normal(k4, (out_channels,), jnp.float32) * 0.1,
        # DoubleConv: Conv2d(cat, out, 3, pad=1, bias=False); Conv2d(out, out, 3, pad=1, bias=False)
        "w_conv1": jax.random.normal(k5, (out_channels, cat_channels, 3, 3), jnp.float32) * 0.1,
        "w_conv2": jax.random.normal(k6, (out_channels, out_channels, 3, 3), jnp.float32) * 0.1,
    }

    out = jax.block_until_ready(up_and_concat_forward(x, contracting_x, params))
    ref = jax.block_until_ready(_ref_forward(x, contracting_x, params))

    assert out.shape == (N, out_channels, 2 * H, 2 * W)
    np.testing.assert_allclose(np.asarray(out), np.asarray(ref), rtol=5e-3, atol=5e-3)
    print("KERNEL_OK")
</pallas_src>

<mosaic_0001>
module attributes {stable_mosaic.version = 11 : i64} {
  func.func @_upconv_kernel(%arg0: i32, %arg1: memref<1x64x16xbf16, #tpu.memory_space<vmem>>, %arg2: memref<16x32xbf16, #tpu.memory_space<vmem>>, %arg3: memref<1x32xf32, #tpu.memory_space<vmem>>, %arg4: memref<1x64x32xbf16, #tpu.memory_space<vmem>>) attributes {dimension_semantics = [#tpu.dimension_semantics<parallel>], iteration_bounds = array<i64: 2>, scalar_prefetch = 0 : i64, scratch_operands = 0 : i64, tpu.core_type = #tpu.core_type<tc>, window_params = [{transform_indices = @transform_0, window_bounds = array<i64: 1, 64, 16>}, {pipeline_mode = #tpu.pipeline_mode<synchronous>, transform_indices = @transform_1, window_bounds = array<i64: 16, 32>}, {pipeline_mode = #tpu.pipeline_mode<synchronous>, transform_indices = @transform_2, window_bounds = array<i64: 1, 32>}, {transform_indices = @transform_3, window_bounds = array<i64: 1, 64, 32>}]} {
    %c0 = arith.constant 0 : index
    %c0_0 = arith.constant 0 : index
    %c0_1 = arith.constant 0 : index
    %0 = vector.load %arg1[%c0, %c0_0, %c0_1] : memref<1x64x16xbf16, #tpu.memory_space<vmem>>, vector<1x64x16xbf16>
    %1 = vector.shape_cast %0 : vector<1x64x16xbf16> to vector<64x16xbf16>
    %c0_2 = arith.constant 0 : index
    %c0_3 = arith.constant 0 : index
    %2 = vector.load %arg2[%c0_2, %c0_3] : memref<16x32xbf16, #tpu.memory_space<vmem>>, vector<16x32xbf16>
    %cst = arith.constant dense<0.000000e+00> : vector<64x32xf32>
    %3 = tpu.matmul %1, %2, %cst {dimension_numbers = #tpu.dot_dimension_numbers<[1], [0], [0], [1], [0, 0, 1, 1], [], []>} : vector<64x16xbf16>, vector<16x32xbf16>, vector<64x32xf32> -> vector<64x32xf32>
    %c0_4 = arith.constant 0 : index
    %c0_5 = arith.constant 0 : index
    %4 = vector.load %arg3[%c0_4, %c0_5] : memref<1x32xf32, #tpu.memory_space<vmem>>, vector<1x32xf32>
    %5 = vector.broadcast %4 : vector<1x32xf32> to vector<64x32xf32>
    %6 = arith.addf %3, %5 : vector<64x32xf32>
    %7 = arith.truncf %6 : vector<64x32xf32> to vector<64x32xbf16>
    %c0_6 = arith.constant 0 : index
    %c0_7 = arith.constant 0 : index
    %c0_8 = arith.constant 0 : index
    %8 = vector.load %arg4[%c0_6, %c0_7, %c0_8] : memref<1x64x32xbf16, #tpu.memory_space<vmem>>, vector<1x64x32xbf16>
    %9 = vector.shape_cast %8 : vector<1x64x32xbf16> to vector<64x32xbf16>
    %10 = vector.shape_cast %7 : vector<64x32xbf16> to vector<1x64x32xbf16>
    tpu.vector_store %arg4[%c0_6, %c0_7, %c0_8], %10 {strides = array<i32>} : memref<1x64x32xbf16, #tpu.memory_space<vmem>>, vector<1x64x32xbf16>,
    return
  }
  func.func @transform_0(%arg0: i32) -> (i32, i32, i32) {
    %c0_i32 = arith.constant 0 : i32
    %c0_i32_0 = arith.constant 0 : i32
    %c0_i32_1 = arith.constant 0 : i32
    return %arg0, %c0_i32, %c0_i32_0 : i32, i32, i32
  }
  func.func @transform_1(%arg0: i32) -> (i32, i32) {
    %c0_i32 = arith.constant 0 : i32
    %c0_i32_0 = arith.constant 0 : i32
    %c0_i32_1 = arith.constant 0 : i32
    return %c0_i32, %c0_i32_0 : i32, i32
  }
  func.func @transform_2(%arg0: i32) -> (i32, i32) {
    %c0_i32 = arith.constant 0 : i32
    %c0_i32_0 = arith.constant 0 : i32
    %c0_i32_1 = arith.constant 0 : i32
    return %c0_i32, %c0_i32_0 : i32, i32
  }
  func.func @transform_3(%arg0: i32) -> (i32, i32, i32) {
    %c0_i32 = arith.constant 0 : i32
    %c0_i32_0 = arith.constant 0 : i32
    %c0_i32_1 = arith.constant 0 : i32
    return %arg0, %c0_i32, %c0_i32_0 : i32, i32, i32
  }
}

</mosaic_0001>

<bundles_post_ra>
// kernel: tpu_custom_call.1
= control target key start
LH: loop header
LB: loop body
LE: loop exit
PB: predicated region body
PF: predicated region fallthrough
CT: control target
= control target key end

     0   :  { %s486_s12 = smov 0   ;;  %s517_s0 = inlined_call_operand.vmem [shape: bf16[2,64,16], index: 0, kind: input, shape index: {}]   ;;  %s518_s1 = inlined_call_operand.vmem [shape: bf16[16,32], index: 1, kind: input, shape index: {}]   ;;  %s519_s2 = inlined_call_operand.vmem [shape: f32[1,32], index: 2, kind: input, shape index: {}]   ;;  %s520_s3 = inlined_call_operand.vmem [shape: bf16[2,64,32], index: 3, kind: output, shape index: {}]  }
   0x1 LB: > { %s389_s13 = sadd.s32 4294967295, %s464_s12   ;;  %p393_p0 = scmp.ge.s32.totalorder %s464_s12, 1  ;;  %s464_s12 = sphi %s486_s12, %s13_s12  }
   0x2   : > { %p137_p1 = scmp.lt.s32.totalorder %s464_s12, 3 }
   0x4   : > { %p138_p2 = pnand %p393_p0, %p137_p1 }
   0x5   : > { %p161_p3 = scmp.lt.s32.totalorder (!%p138_p2), %s389_s13, 1 }
   0x6   : > { %141 = sbr.rel (%p138_p2) target bundleno = 220 (0xdc), region = 32 }
   0xb   : > { %v453_v0 = vld [vmem:[%s518_s1] sm:$0xff]   ;;  %s522_s13 = smov (!%p161_p3, %s389_s13), 1  ;;  %vm215_vm0 = vcmask 130048   ;;  %vm325_vm1 = vcmask 257024  }
   0xc   : > { %433 = vmatprep.subr.bf16.mxu0 %v453_v0  ;;  %443 = vmatprep.subr.bf16.mxu1 %v453_v0  ;;  %s418_s16 = sshll.u32 %s522_s13, 5  ;;  %v398_v5 = vld [vmem:[%s519_s2] ss:$0 sm:$0xff] }
   0xd   : > { %434 = vmatpush3.bf16.msra.mxu0 %v453_v0  ;;  %444 = vmatpush3.bf16.msra.mxu1 %v453_v0  ;;  %s165_s19 = scalar_lea.vmem %s517_s0, %s418_s16  ;;  %s170_s24 = scalar_lea.vmem %s520_s3, %s418_s16 }
   0xe   : > { %v454_v1 = vld [vmem:[%s165_s19] sm:$0xff]   ;;  %v455_v2 = vld [vmem:[%s165_s19 + $0x10] sm:$0xff]   ;;  %v456_v3 = vld [vmem:[%s165_s19 + $0x8] sm:$0xff]  }
   0xf   : > { %435 = vmatprep.mubr.msk.bf16.mxu0 %vm215_vm0, %v454_v1  ;;  %439 = vmatprep.mubr.msk.bf16.mxu1 %vm215_vm0, %v455_v2  ;;  %v457_v4 = vld [vmem:[%s165_s19 + $0x18] sm:$0xff]  }
  0x10   : > { %436 = vmatmul.mubr.msk.bf16.vlgmr.msra.gmra.mxu0 %vm215_vm0, %v456_v3  ;;  %440 = vmatmul.mubr.msk.bf16.vlgmr.msra.gmra.mxu1 %vm215_vm0, %v457_v4 }
  0xd0   : > { %v437_v6 = vpop.f32.mrf.mxu0  ;;  %v441_v8 = vpop.f32.mrf.mxu1 }
  0xd1   : > { %v271_v7 = vadd.f32 %v437_v6, %v398_v5  ;;  %v287_v9 = vadd.f32 %v441_v8, %v398_v5 }
  0xd2   : > { %v262_v10 = vpop.f32.mrf.mxu0  ;;  %v278_v13 = vpop.f32.mrf.mxu1 }
  0xd3   : > { %v422_v11 = vpack.c.bf16 %v271_v7, %v271_v7  ;;  %v263_v12 = vadd.f32 %v398_v5, %v262_v10  ;;  %v426_v14 = vpack.c.bf16 %v287_v9, %v287_v9  ;;  %v279_v15 = vadd.f32 %v398_v5, %v278_v13 }
  0xd4   : > { %v438_v16 = vpop.f32.mrf.mxu0  ;;  %v442_v19 = vpop.f32.mrf.mxu1 }
  0xd5   : > { %328 = vst.msk [vmem:[%s170_s24 + $0x8] sm:$0xf] %vm325_vm1, %v422_v11  ;;  %v420_v17 = vpack.c.bf16 %v263_v12, %v263_v12  ;;  %v274_v18 = vadd.f32 %v438_v16, %v398_v5  ;;  %332 = vst.msk [vmem:[%s170_s24 + $0x18] sm:$0xf] %vm325_vm1, %v426_v14  ;;  %v424_v20 = vpack.c.bf16 %v279_v15, %v279_v15 }
  0xd6   : > { %v290_v21 = vadd.f32 %v442_v19, %v398_v5  ;;  %v265_v22 = vpop.f32.mrf.mxu0  ;;  %v281_v25 = vpop.f32.mrf.mxu1 }
  0xd7   : > { %326 = vst.msk [vmem:[%s170_s24] sm:$0xf] %vm325_vm1, %v420_v17  ;;  %v423_v23 = vpack.c.bf16 %v274_v18, %v274_v18  ;;  %v266_v24 = vadd.f32 %v398_v5, %v265_v22  ;;  %330 = vst.msk [vmem:[%s170_s24 + $0x10] sm:$0xf] %vm325_vm1, %v424_v20  ;;  %v282_v27 = vadd.f32 %v398_v5, %v281_v25 }
  0xd8   : > { %v427_v26 = vpack.c.bf16 %v290_v21, %v290_v21 }
  0xd9   : > { %329 = vst.msk [vmem:[%s170_s24 + $0xc] sm:$0xf] %vm325_vm1, %v423_v23  ;;  %v421_v28 = vpack.c.bf16 %v266_v24, %v266_v24  ;;  %v425_v29 = vpack.c.bf16 %v282_v27, %v282_v27 }
  0xda   : > { %333 = vst.msk [vmem:[%s170_s24 + $0x1c] sm:$0xf] %vm325_vm1, %v427_v26 }
  0xdb   : > { %327 = vst.msk [vmem:[%s170_s24 + $0x4] sm:$0xf] %vm325_vm1, %v421_v28  ;;  %331 = vst.msk [vmem:[%s170_s24 + $0x14] sm:$0xf] %vm325_vm1, %v425_v29 }
  0xdc PF: > { %s13_s12 = sadd.s32 1, %s464_s12  }
  0xdd   : > { %p10_p4 = scmp.ge.s32.totalorder %s13_s12, 4  }
  0xdf   :  { %12 = sbr.rel (!%p10_p4) target bundleno = 1 (0x1), region = 62 }

</bundles_post_ra>
